<compile_context>
chip_gen: v7x
topology: tpu7x:2x2x1
jax: 0.10.0
libtpu: 0.0.40
codegen_flags: <defaults>
</compile_context>

<pallas_src>
import functools

import jax
import jax.numpy as jnp
from jax.experimental import pallas as pl
from jax.experimental.pallas import tpu as pltpu


def _round_up(x, m):
    return (x + m - 1) // m * m


# --------------------------------------------------------------------------- #
# Kernel: one grid step == one GCN layer: relu(layernorm(Â @ (X @ W) + b))
# --------------------------------------------------------------------------- #
def _fused_gnn_kernel(a_ref, x_ref, w_ref, b_ref, g_ref, bt_ref, o_ref,
                      *, f_true, eps):
    layer = pl.program_id(0)

    @pl.when(layer == 0)
    def _():
        # Seed the layer-to-layer carry with the input features.  The output
        # block has a constant block index, so it stays resident in VMEM for
        # the whole grid and is written back to HBM exactly once at the end.
        o_ref[...] = x_ref[...]

    x_cur = o_ref[...]                                   # f32 [Np, Fp]

    # Feature transform on the MXU (bf16 inputs, f32 accumulation).
    xw = jnp.dot(x_cur.astype(jnp.bfloat16), w_ref[...],
                 preferred_element_type=jnp.float32)
    # Neighborhood aggregation with the dense normalized adjacency Â (bf16).
    h = jnp.dot(a_ref[...], xw.astype(jnp.bfloat16),
                preferred_element_type=jnp.float32)
    h = h + b_ref[...]                                   # bias, broadcast over nodes

    # LayerNorm over the TRUE feature width only.  Padded lanes of h are zero
    # (padded W columns / bias lanes are zero), so full-lane sums are exact and
    # we only need to divide by f_true instead of the padded width.
    inv_f = 1.0 / float(f_true)
    s1 = jnp.sum(h, axis=-1, keepdims=True)
    s2 = jnp.sum(h * h, axis=-1, keepdims=True)
    mean = s1 * inv_f
    var = jnp.maximum(s2 * inv_f - mean * mean, 0.0)
    hn = (h - mean) * jax.lax.rsqrt(var + eps)
    hn = hn * g_ref[...] + bt_ref[...]                   # padded gamma/beta lanes are 0
                                                         # -> padded output lanes stay 0
    # ReLU; store the carry for the next layer (and the final output).
    o_ref[...] = jnp.maximum(hn, 0.0).astype(o_ref.dtype)


# --------------------------------------------------------------------------- #
# Pallas call wrapper
# --------------------------------------------------------------------------- #
@functools.partial(jax.jit, static_argnames=("f_true",))
def _partial_gnn_pallas(a_pad, x_pad, w_stack, b_stack, g_stack, bt_stack,
                        *, f_true):
    num_layers, fp, _ = w_stack.shape
    np_, _ = x_pad.shape

    kernel = functools.partial(_fused_gnn_kernel, f_true=f_true, eps=1e-5)

    flops = num_layers * (2 * np_ * fp * fp + 2 * np_ * np_ * fp)
    bytes_accessed = (a_pad.size * 2 + x_pad.size * 4 + w_stack.size * 2
                      + (b_stack.size + g_stack.size + bt_stack.size) * 4
                      + np_ * fp * 4)
    cost = pl.CostEstimate(flops=flops,
                           transcendentals=num_layers * np_,
                           bytes_accessed=bytes_accessed)

    return pl.pallas_call(
        kernel,
        out_shape=jax.ShapeDtypeStruct((np_, fp), jnp.float32),
        grid=(num_layers,),
        in_specs=[
            pl.BlockSpec((np_, np_), lambda l: (0, 0)),         # Â  (bf16), loaded once
            pl.BlockSpec((np_, fp), lambda l: (0, 0)),          # X0 (f32)
            pl.BlockSpec((None, fp, fp), lambda l: (l, 0, 0)),  # W_l     (bf16)
            pl.BlockSpec((None, 1, fp), lambda l: (l, 0, 0)),   # bias_l  (f32)
            pl.BlockSpec((None, 1, fp), lambda l: (l, 0, 0)),   # gamma_l (f32)
            pl.BlockSpec((None, 1, fp), lambda l: (l, 0, 0)),   # beta_l  (f32)
        ],
        out_specs=pl.BlockSpec((np_, fp), lambda l: (0, 0)),    # X carry / output
        compiler_params=pltpu.CompilerParams(
            dimension_semantics=("arbitrary",)),                # layer loop is sequential
        cost_estimate=cost,
    )(a_pad, x_pad, w_stack, b_stack, g_stack, bt_stack)


def partial_gnn_forward(x, a_hat, params):
    """params: tuple of (W [Fin,Fout], b [1,Fout], gamma [1,Fout], beta [1,Fout])."""
    n, f_in = x.shape
    f_out = params[0][0].shape[1]
    for (w, _, _, _) in params:
        assert w.shape[1] == f_out, "all layers must share the same output width"

    fp = _round_up(max(f_in, f_out, max(w.shape[0] for (w, _, _, _) in params)), 128)
    np_ = _round_up(n, 8)

    # Zero-pad operands to lane/sublane-friendly shapes; cast matmul operands to bf16.
    a_pad = jnp.zeros((np_, np_), jnp.bfloat16).at[:n, :n].set(a_hat.astype(jnp.bfloat16))
    x_pad = jnp.zeros((np_, fp), jnp.float32).at[:n, :f_in].set(x.astype(jnp.float32))

    def pad_w(w):
        return (jnp.zeros((fp, fp), jnp.bfloat16)
                .at[:w.shape[0], :w.shape[1]].set(w.astype(jnp.bfloat16)))

    def pad_row(v):
        v = v.reshape(1, -1).astype(jnp.float32)
        return jnp.zeros((1, fp), jnp.float32).at[:, :v.shape[1]].set(v)

    w_stack = jnp.stack([pad_w(w) for (w, _, _, _) in params])
    b_stack = jnp.stack([pad_row(b) for (_, b, _, _) in params])
    g_stack = jnp.stack([pad_row(g) for (_, _, g, _) in params])
    bt_stack = jnp.stack([pad_row(bt) for (_, _, _, bt) in params])

    out_pad = _partial_gnn_pallas(a_pad, x_pad, w_stack, b_stack, g_stack,
                                  bt_stack, f_true=f_out)
    return out_pad[:n, :f_out]


# --------------------------------------------------------------------------- #
# Graph glue (plain JAX): dense Â = D^-1/2 (A + self-loops) D^-1/2
# --------------------------------------------------------------------------- #
def build_normalized_adjacency(edge_index, num_nodes):
    src, dst = edge_index[0], edge_index[1]
    not_loop = (src != dst).astype(jnp.float32)          # drop given self-loops
    a = jnp.zeros((num_nodes, num_nodes), jnp.float32)
    a = a.at[dst, src].add(not_loop)                     # duplicate edges count twice (PyG)
    a = a + jnp.eye(num_nodes, dtype=jnp.float32)        # remaining self-loops, weight 1
    deg = jnp.sum(a, axis=1)
    d_inv_sqrt = jnp.where(deg > 0, jax.lax.rsqrt(deg), 0.0)
    return d_inv_sqrt[:, None] * a * d_inv_sqrt[None, :]


def _reference_forward(x, a_hat, params, eps=1e-5):
    """Pure-JAX f32 reference for validation."""
    for (w, b, gamma, beta) in params:
        h = a_hat @ (x @ w) + b
        mean = jnp.mean(h, axis=-1, keepdims=True)
        var = jnp.mean((h - mean) ** 2, axis=-1, keepdims=True)
        h = (h - mean) * jax.lax.rsqrt(var + eps) * gamma + beta
        x = jnp.maximum(h, 0.0)
    return x


if __name__ == "__main__":
    # Small shapes consistent with the module: N nodes, hidden feature dim.
    num_nodes = 16
    in_dim = 32
    hidden_dim = 32
    num_layers = 2

    key = jax.random.PRNGKey(0)
    k_x, k_e, *k_w = jax.random.split(key, 2 + num_layers)

    # Node features.
    x = jax.random.normal(k_x, (num_nodes, in_dim), dtype=jnp.float32)

    # Deterministic edge_index: a bidirectional ring plus a few random edges.
    ring_src = jnp.arange(num_nodes)
    ring_dst = (ring_src + 1) % num_nodes
    rand_src = jax.random.randint(k_e, (8,), 0, num_nodes)
    rand_dst = (rand_src + 3) % num_nodes
    src = jnp.concatenate([ring_src, ring_dst, rand_src])
    dst = jnp.concatenate([ring_dst, ring_src, rand_dst])
    edge_index = jnp.stack([src, dst], axis=0)            # [2, E]

    a_hat = build_normalized_adjacency(edge_index, num_nodes)

    # Deterministic per-layer parameters: GCNConv weight/bias + LayerNorm affine.
    params = []
    dims = [in_dim] + [hidden_dim] * num_layers
    for i in range(num_layers):
        fan_in, fan_out = dims[i], dims[i + 1]
        w = jax.random.normal(k_w[i], (fan_in, fan_out), dtype=jnp.float32)
        w = w * (1.0 / jnp.sqrt(jnp.float32(fan_in)))      # glorot-ish scale
        b = jnp.zeros((1, fan_out), dtype=jnp.float32)
        gamma = jnp.ones((1, fan_out), dtype=jnp.float32)
        beta = jnp.zeros((1, fan_out), dtype=jnp.float32)
        params.append((w, b, gamma, beta))
    params = tuple(params)

    out = partial_gnn_forward(x, a_hat, params)
    jax.block_until_ready(out)

    assert out.shape == (num_nodes, hidden_dim)
    assert out.dtype == jnp.float32
    assert bool(jnp.all(jnp.isfinite(out)))

    ref = _reference_forward(x, a_hat, params)
    max_err = float(jnp.max(jnp.abs(out - ref)))
    assert max_err < 0.3, f"max abs error vs f32 reference: {max_err}"

    print("KERNEL_OK")
</pallas_src>

<mosaic_0001>
module attributes {stable_mosaic.version = 11 : i64} {
  func.func @_fused_gnn_kernel(%arg0: i32, %arg1: memref<16x16xbf16, #tpu.memory_space<vmem>>, %arg2: memref<16x128xf32, #tpu.memory_space<vmem>>, %arg3: memref<1x128x128xbf16, #tpu.memory_space<vmem>>, %arg4: memref<1x1x128xf32, #tpu.memory_space<vmem>>, %arg5: memref<1x1x128xf32, #tpu.memory_space<vmem>>, %arg6: memref<1x1x128xf32, #tpu.memory_space<vmem>>, %arg7: memref<16x128xf32, #tpu.memory_space<vmem>>) attributes {dimension_semantics = [#tpu.dimension_semantics<arbitrary>], iteration_bounds = array<i64: 2>, scalar_prefetch = 0 : i64, scratch_operands = 0 : i64, tpu.core_type = #tpu.core_type<tc>, window_params = [{pipeline_mode = #tpu.pipeline_mode<synchronous>, transform_indices = @transform_0, window_bounds = array<i64: 16, 16>}, {pipeline_mode = #tpu.pipeline_mode<synchronous>, transform_indices = @transform_1, window_bounds = array<i64: 16, 128>}, {transform_indices = @transform_2, window_bounds = array<i64: 1, 128, 128>}, {transform_indices = @transform_3, window_bounds = array<i64: 1, 1, 128>}, {transform_indices = @transform_4, window_bounds = array<i64: 1, 1, 128>}, {transform_indices = @transform_5, window_bounds = array<i64: 1, 1, 128>}, {pipeline_mode = #tpu.pipeline_mode<synchronous>, transform_indices = @transform_6, window_bounds = array<i64: 16, 128>}]} {
    %c0_i32 = arith.constant 0 : i32
    %0 = arith.cmpi eq, %arg0, %c0_i32 : i32
    %1 = arith.extui %0 : i1 to i32
    %c0_i32_0 = arith.constant 0 : i32
    %2 = arith.cmpi ne, %1, %c0_i32_0 : i32
    scf.if %2 {
      %c0_26 = arith.constant 0 : index
      %c0_27 = arith.constant 0 : index
      %46 = vector.load %arg2[%c0_26, %c0_27] : memref<16x128xf32, #tpu.memory_space<vmem>>, vector<16x128xf32>
      %c0_28 = arith.constant 0 : index
      %c0_29 = arith.constant 0 : index
      %47 = vector.load %arg7[%c0_28, %c0_29] : memref<16x128xf32, #tpu.memory_space<vmem>>, vector<16x128xf32>
      tpu.vector_store %arg7[%c0_28, %c0_29], %46 {strides = array<i32>} : memref<16x128xf32, #tpu.memory_space<vmem>>, vector<16x128xf32>,
    } else {
    }
    %c0 = arith.constant 0 : index
    %c0_1 = arith.constant 0 : index
    %3 = vector.load %arg7[%c0, %c0_1] : memref<16x128xf32, #tpu.memory_space<vmem>>, vector<16x128xf32>
    %4 = arith.truncf %3 : vector<16x128xf32> to vector<16x128xbf16>
    %c0_2 = arith.constant 0 : index
    %c0_3 = arith.constant 0 : index
    %c0_4 = arith.constant 0 : index
    %5 = vector.load %arg3[%c0_2, %c0_3, %c0_4] : memref<1x128x128xbf16, #tpu.memory_space<vmem>>, vector<1x128x128xbf16>
    %6 = vector.shape_cast %5 : vector<1x128x128xbf16> to vector<128x128xbf16>
    %cst = arith.constant dense<0.000000e+00> : vector<16x128xf32>
    %7 = tpu.matmul %4, %6, %cst {dimension_numbers = #tpu.dot_dimension_numbers<[1], [0], [0], [1], [0, 0, 1, 1], [], []>} : vector<16x128xbf16>, vector<128x128xbf16>, vector<16x128xf32> -> vector<16x128xf32>
    %c0_5 = arith.constant 0 : index
    %c0_6 = arith.constant 0 : index
    %8 = vector.load %arg1[%c0_5, %c0_6] : memref<16x16xbf16, #tpu.memory_space<vmem>>, vector<16x16xbf16>
    %9 = arith.truncf %7 : vector<16x128xf32> to vector<16x128xbf16>
    %cst_7 = arith.constant dense<0.000000e+00> : vector<16x128xf32>
    %10 = tpu.matmul %8, %9, %cst_7 {dimension_numbers = #tpu.dot_dimension_numbers<[1], [0], [0], [1], [0, 0, 1, 1], [], []>} : vector<16x16xbf16>, vector<16x128xbf16>, vector<16x128xf32> -> vector<16x128xf32>
    %c0_8 = arith.constant 0 : index
    %c0_9 = arith.constant 0 : index
    %c0_10 = arith.constant 0 : index
    %11 = vector.load %arg4[%c0_8, %c0_9, %c0_10] : memref<1x1x128xf32, #tpu.memory_space<vmem>>, vector<1x1x128xf32>
    %12 = vector.shape_cast %11 : vector<1x1x128xf32> to vector<1x128xf32>
    %13 = vector.broadcast %12 : vector<1x128xf32> to vector<16x128xf32>
    %14 = arith.addf %10, %13 : vector<16x128xf32>
    %cst_11 = arith.constant dense<0.000000e+00> : vector<16xf32>
    %15 = vector.multi_reduction <add>, %14, %cst_11 [1] : vector<16x128xf32> to vector<16xf32>
    %16 = vector.shape_cast %15 : vector<16xf32> to vector<16x1xf32>
    %17 = arith.mulf %14, %14 : vector<16x128xf32>
    %cst_12 = arith.constant dense<0.000000e+00> : vector<16xf32>
    %18 = vector.multi_reduction <add>, %17, %cst_12 [1] : vector<16x128xf32> to vector<16xf32>
    %19 = vector.shape_cast %18 : vector<16xf32> to vector<16x1xf32>
    %cst_13 = arith.constant 3.125000e-02 : f32
    %20 = vector.broadcast %cst_13 : f32 to vector<16x1xf32>
    %21 = arith.mulf %16, %20 : vector<16x1xf32>
    %cst_14 = arith.constant 3.125000e-02 : f32
    %22 = vector.broadcast %cst_14 : f32 to vector<16x1xf32>
    %23 = arith.mulf %19, %22 : vector<16x1xf32>
    %24 = arith.mulf %21, %21 : vector<16x1xf32>
    %25 = arith.subf %23, %24 : vector<16x1xf32>
    %cst_15 = arith.constant 0.000000e+00 : f32
    %26 = vector.broadcast %cst_15 : f32 to vector<16x1xf32>
    %27 = arith.maximumf %25, %26 : vector<16x1xf32>
    %28 = vector.broadcast %21 : vector<16x1xf32> to vector<16x128xf32>
    %29 = arith.subf %14, %28 : vector<16x128xf32>
    %cst_16 = arith.constant 9.99999974E-6 : f32
    %30 = vector.broadcast %cst_16 : f32 to vector<16x1xf32>
    %31 = arith.addf %27, %30 : vector<16x1xf32>
    %32 = math.rsqrt %31 : vector<16x1xf32>
    %33 = vector.broadcast %32 : vector<16x1xf32> to vector<16x128xf32>
    %34 = arith.mulf %29, %33 : vector<16x128xf32>
    %c0_17 = arith.constant 0 : index
    %c0_18 = arith.constant 0 : index
    %c0_19 = arith.constant 0 : index
    %35 = vector.load %arg5[%c0_17, %c0_18, %c0_19] : memref<1x1x128xf32, #tpu.memory_space<vmem>>, vector<1x1x128xf32>
    %36 = vector.shape_cast %35 : vector<1x1x128xf32> to vector<1x128xf32>
    %37 = vector.broadcast %36 : vector<1x128xf32> to vector<16x128xf32>
    %38 = arith.mulf %34, %37 : vector<16x128xf32>
    %c0_20 = arith.constant 0 : index
    %c0_21 = arith.constant 0 : index
    %c0_22 = arith.constant 0 : index
    %39 = vector.load %arg6[%c0_20, %c0_21, %c0_22] : memref<1x1x128xf32, #tpu.memory_space<vmem>>, vector<1x1x128xf32>
    %40 = vector.shape_cast %39 : vector<1x1x128xf32> to vector<1x128xf32>
    %41 = vector.broadcast %40 : vector<1x128xf32> to vector<16x128xf32>
    %42 = arith.addf %38, %41 : vector<16x128xf32>
    %cst_23 = arith.constant 0.000000e+00 : f32
    %43 = vector.broadcast %cst_23 : f32 to vector<16x128xf32>
    %44 = arith.maximumf %42, %43 : vector<16x128xf32>
    %c0_24 = arith.constant 0 : index
    %c0_25 = arith.constant 0 : index
    %45 = vector.load %arg7[%c0_24, %c0_25] : memref<16x128xf32, #tpu.memory_space<vmem>>, vector<16x128xf32>
    tpu.vector_store %arg7[%c0_24, %c0_25], %44 {strides = array<i32>} : memref<16x128xf32, #tpu.memory_space<vmem>>, vector<16x128xf32>,
    return
  }
  func.func @transform_0(%arg0: i32) -> (i32, i32) {
    %c0_i32 = arith.constant 0 : i32
    %c0_i32_0 = arith.constant 0 : i32
    %c0_i32_1 = arith.constant 0 : i32
    return %c0_i32, %c0_i32_0 : i32, i32
  }
  func.func @transform_1(%arg0: i32) -> (i32, i32) {
    %c0_i32 = arith.constant 0 : i32
    %c0_i32_0 = arith.constant 0 : i32
    %c0_i32_1 = arith.constant 0 : i32
    return %c0_i32, %c0_i32_0 : i32, i32
  }
  func.func @transform_2(%arg0: i32) -> (i32, i32, i32) {
    %c0_i32 = arith.constant 0 : i32
    %c0_i32_0 = arith.constant 0 : i32
    %c0_i32_1 = arith.constant 0 : i32
    return %arg0, %c0_i32, %c0_i32_0 : i32, i32, i32
  }
  func.func @transform_3(%arg0: i32) -> (i32, i32, i32) {
    %c0_i32 = arith.constant 0 : i32
    %c0_i32_0 = arith.constant 0 : i32
    %c0_i32_1 = arith.constant 0 : i32
    return %arg0, %c0_i32, %c0_i32_0 : i32, i32, i32
  }
  func.func @transform_4(%arg0: i32) -> (i32, i32, i32) {
    %c0_i32 = arith.constant 0 : i32
    %c0_i32_0 = arith.constant 0 : i32
    %c0_i32_1 = arith.constant 0 : i32
    return %arg0, %c0_i32, %c0_i32_0 : i32, i32, i32
  }
  func.func @transform_5(%arg0: i32) -> (i32, i32, i32) {
    %c0_i32 = arith.constant 0 : i32
    %c0_i32_0 = arith.constant 0 : i32
    %c0_i32_1 = arith.constant 0 : i32
    return %arg0, %c0_i32, %c0_i32_0 : i32, i32, i32
  }
  func.func @transform_6(%arg0: i32) -> (i32, i32) {
    %c0_i32 = arith.constant 0 : i32
    %c0_i32_0 = arith.constant 0 : i32
    %c0_i32_1 = arith.constant 0 : i32
    return %c0_i32, %c0_i32_0 : i32, i32
  }
}

</mosaic_0001>

<bundles_post_ra>
// kernel: _partial_gnn_pallas.1
= control target key start
LH: loop header
LB: loop body
LE: loop exit
PB: predicated region body
PF: predicated region fallthrough
CT: control target
= control target key end

     0   :  { %11 = vsyncpa [#allocation3], 0  ;;  %s1270_s0 = inlined_call_operand.hbm [shape: bf16[16,16], index: 0, kind: input, shape index: {}]   ;;  %s1271_s1 = inlined_call_operand.hbm [shape: f32[16,128], index: 1, kind: input, shape index: {}]   ;;  %s1272_s2 = inlined_call_operand.hbm [shape: bf16[2,128,128], index: 2, kind: input, shape index: {}]   ;;  %s1273_s3 = inlined_call_operand.vmem [shape: f32[2,1,128], index: 3, kind: input, shape index: {}]   ;;  %s1274_s4 = inlined_call_operand.vmem [shape: f32[2,1,128], index: 4, kind: input, shape index: {}]   ;;  %s1275_s5 = inlined_call_operand.vmem [shape: f32[2,1,128], index: 5, kind: input, shape index: {}]   ;;  %s1276_s6 = inlined_call_operand.hbm [shape: f32[16,128], index: 6, kind: output, shape index: {}]  }
   0x1   :  { %12 = vsyncpa [#allocation6], 0 }
   0x2   :  { %13 = vsyncpa [#allocation4], 0  ;;  %s1022_s21 = smov 0   ;;  %s1024_s22 = smov 0  }
   0x3   :  { %s1026_s23 = smov 0   ;;  %s1028_s24 = smov 0  }
   0x4 LB: > { %s1041_s25 = sadd.s32 4294967295, %s973_s24   ;;  %s1044_s26 = sadd.s32 1, %s973_s24   ;;  %s973_s24 = sphi %s1028_s24, %s1301_s24   ;;  %s969_s23 = sphi %s1026_s23, %s1300_s23   ;;  %s965_s22 = sphi %s1024_s22, %s1299_s22   ;;  %s961_s21 = sphi %s1022_s21, %s1298_s21  }
   0x5   : > { %s65_s27 = ssub.s32 %s973_s24, %s1044_s26  ;;  %s68_s28 = sadd.s32 1, %s969_s23 }
   0x6   : > { %p66_p0 = scmp.eq.s32.totalorder %s65_s27, 0  ;;  %p75_p1 = scmp.ne.s32.totalorder %s969_s23, %s965_s22 }
   0x7   : > { %p76_p2 = scmp.eq.s32.totalorder %s973_s24, 0  ;;  %p81_p3 = scmp.ne.s32.totalorder %s965_s22, %s961_s21 }
   0x8   : > { %s1054_s29 = scalar_select %p66_p0, %s969_s23, %s68_s28  }
   0x9   : > { %p1056_p4 = por %p76_p2, %p75_p1  ;;  %p1277_p5 = scmp.eq.s32.totalorder %s1041_s25, 0 }
   0xa   : > { %p660_p6 = scmp.ge.s32.totalorder %s973_s24, 1  ;;  %p191_p7 = scmp.lt.s32.totalorder %s973_s24, 3 }
   0xb   : > { %p1065_p8 = por %p1277_p5, %p81_p3  ;;  %s975_s9 = smov [#allocation2]  }
   0xc   : > { %p1070_p10 = pnand %p660_p6, %p191_p7  ;;  %s203_s10 = sshll.u32 %s975_s9, 4  ;;  %s204_s10 = int_to_ptr.vmem [resolvable:$true] %s203_s10 }
   0xd   : > { %s1284_s7 = scalar_select %p1065_p8, 1, 0 }
   0xe   : > { %s1285_s8 = scalar_select %p1070_p10, 1, 0 }
   0xf   : > { %p741_p11 = pneg %p1070_p10  ;;  %p754_p13 = scmp.lt.s32.totalorder %s973_s24, 2 }
  0x10   : > { %s815_s15 = scalar_lea.hbm %s1270_s0, 128 }
  0x11   : > { %p1078_p12 = pnand %p741_p11, %p1277_p5  ;;  %p1085_p0 = pnand %p754_p13, %p1056_p4 }
  0x12   : > { %p816_p1 = scmp.ne.s32.totalorder %s1270_s0, %s815_s15  ;;  %p822_p4 = scmp.lt.u32.totalorder %s815_s15, %s1270_s0 }
  0x13   : > { %s1287_s12 = scalar_select %p1085_p0, 1, 0 }
  0x14   : > { %p817_p2 = pneg %p1078_p12 }
  0x16   : > { %p818_p3 = pnand %p817_p2, %p816_p1 }
  0x18   : > { %p819_p6 = pneg %p818_p3 }
  0x1a   : > { %p824_p7 = pnand %p822_p4, %p819_p6 }
  0x1c   : > { %827 = shalt.err (!%p824_p7)
}
  0x1d   : > { %s828_s20 = scalar_lea.vmem %s204_s10, 128  ;;  %p836_p5 = scmp.lt.s32.totalorder %s204_s10, %s204_s10 }
  0x1e   : > { %p829_p11 = scmp.ne.s32.totalorder %s204_s10, %s828_s20  ;;  %p837_p8 = scmp.lt.s32.totalorder %s828_s20, %s828_s20 }
  0x20   : > { %p831_p13 = pnand %p829_p11, %p817_p2  ;;  %p838_p10 = por %p837_p8, %p836_p5 }
  0x22   : > { %p832_p9 = pneg %p831_p13 }
  0x24   : > { %p839_p0 = pnand %p838_p10, %p832_p9 }
  0x26   : > { %842 = shalt.err (!%p839_p0)
}
  0x27   : > { %s1281_s21 = smov 64   ;;  %s1282_s27 = smov 4  }
  0x28   : > { %744 = dma.hbm_to_vmem [thread:$0]  (!%p1078_p12), %s1270_s0, 128, %s204_s10, [#allocation3], %s1281_s21, %s1281_s21, %s1282_s27  }
  0x29   : > { %s978_s9 = smov [#allocation5]   ;;  %s843_s16 = scalar_lea.hbm %s1271_s1, 256 }
  0x2a   : > { %s216_s13 = sshll.u32 %s978_s9, 4  ;;  %p844_p5 = scmp.ne.s32.totalorder %s1271_s1, %s843_s16  ;;  %s217_s13 = int_to_ptr.vmem [resolvable:$true] %s216_s13 }
  0x2b   : > { %p850_p10 = scmp.lt.u32.totalorder %s843_s16, %s1271_s1 }
  0x2c   : > { %p846_p8 = pnand %p844_p5, %p817_p2 }
  0x2e   : > { %p847_p9 = pneg %p846_p8 }
  0x30   : > { %p852_p0 = pnand %p850_p10, %p847_p9 }
  0x32   : > { %855 = shalt.err (!%p852_p0)
}
  0x33   : > { %s856_s10 = scalar_lea.vmem %s217_s13, 256  ;;  %p864_p4 = scmp.lt.s32.totalorder %s217_s13, %s217_s13 }
  0x34   : > { %p857_p1 = scmp.ne.s32.totalorder %s217_s13, %s856_s10  ;;  %p865_p7 = scmp.lt.s32.totalorder %s856_s10, %s856_s10 }
  0x36   : > { %p859_p3 = pnand %p857_p1, %p817_p2  ;;  %p866_p11 = por %p865_p7, %p864_p4 }
  0x38   : > { %p860_p6 = pneg %p859_p3 }
  0x3a   : > { %p867_p13 = pnand %p866_p11, %p860_p6 }
  0x3c   : > { %870 = shalt.err (!%p867_p13)
}
  0x3d   : > { %s979_s28 = smov 128   ;;  %s980_s30 = smov 8  }
  0x3e   : > { %747 = dma.hbm_to_vmem [thread:$0]  (!%p1078_p12), %s1271_s1, 256, %s217_s13, [#allocation6], %s979_s28, %s979_s28, %s980_s30  }
  0x3f   : > { %s230_s15 = sand.u32 1, %s973_s24   ;;  %s232_s16 = sand.u32 1, %s969_s23  }
  0x40   : > { %s664_s17 = sshll.u32 %s232_s16, 6  ;;  %s689_s18 = sshll.u32 %s973_s24, 10 }
  0x41   : > { %s1140_s10 = scalar_lea.hbm %s1272_s2, %s689_s18  ;;  %s234_s21 = scalar_lea.vmem [#allocation7], %s664_s17 }
  0x42   : > { %s241_s27 = sshll.u32 %s234_s21, 4  ;;  %s1144_s11 = scalar_lea.sflag [#allocation3], %s230_s15  ;;  %s1142_s27 = int_to_ptr.vmem [resolvable:$true] %s241_s27 }
  0x43   : > { %s871_s13 = scalar_lea.hbm %s1140_s10, 1024  ;;  %p1288_p2 = scmp.ne.s32.totalorder %s1287_s12, 0 }
  0x44   : > { %p872_p12 = scmp.ne.s32.totalorder %s1140_s10, %s871_s13  ;;  %s876_s30 = scalar_lea.hbm %s1272_s2, 2048 }
  0x45   : > { %p873_p5 = pneg %p1288_p2  ;;  %p877_p10 = scmp.lt.u32.totalorder %s1140_s10, %s1272_s2 }
  0x46   : > { %p878_p0 = scmp.lt.u32.totalorder %s876_s30, %s871_s13  ;;  %p880_p3 = scmp.lt.u32.totalorder %s871_s13, %s1140_s10 }
  0x47   : > { %p874_p8 = pnand %p873_p5, %p872_p12 }
  0x48   : > { %p879_p1 = por %p878_p0, %p877_p10 }
  0x49   : > { %p875_p9 = pneg %p874_p8 }
  0x4a   : > { %p881_p6 = por %p880_p3, %p879_p1 }
  0x4c   : > { %p882_p4 = pnand %p881_p6, %p875_p9 }
  0x4e   : > { %885 = shalt.err (!%p882_p4)
}
  0x4f   : > { %s886_s21 = scalar_lea.vmem %s1142_s27, 1024  ;;  %s981_s15 = smov [#allocation7]  }
  0x50   : > { %p887_p7 = scmp.ne.s32.totalorder %s1142_s27, %s886_s21  ;;  %s891_s16 = sshll.u32 %s981_s15, 4  ;;  %s892_s16 = int_to_ptr.vmem [resolvable:$false] %s891_s16 }
  0x51   : > { %s893_s17 = scalar_lea.vmem %s892_s16, 2048  ;;  %p894_p12 = scmp.lt.s32.totalorder %s1142_s27, %s892_s16 }
  0x52   : > { %p889_p11 = pnand %p887_p7, %p873_p5  ;;  %p895_p8 = scmp.lt.s32.totalorder %s893_s17, %s886_s21 }
  0x54   : > { %p890_p13 = pneg %p889_p11  ;;  %p896_p10 = por %p895_p8, %p894_p12 }
  0x56   : > { %p897_p0 = pnand %p896_p10, %p890_p13 }
  0x58   : > { %900 = shalt.err (!%p897_p0)
}
  0x59   : > { %s1289_s18 = smov 4   ;;  %s1290_s19 = smov 64  }
  0x5a   : > { %751 = dma.hbm_to_vmem [thread:$0]  (!%p1288_p2), %s1140_s10, 1024, %s1142_s27, %s1144_s11, %s1290_s19, %s1290_s19, %s1289_s18  }
  0x5b   : > { %p1291_p5 = scmp.ne.s32.totalorder %s1285_s8, 0 }
  0x5c   : > { %p1292_p9 = scmp.eq.s32.totalorder (!%p1291_p5), %s1041_s25, 0 }
  0x5d   : > { %271 = sbr.rel (%p1291_p5) target bundleno = 777 (0x309), region = 44 }
  0x64   : > { %944 = dma.done.wait (%p1292_p9), [#allocation3], 128   ;;  %p1293_p1 = pmov %p1292_p9 }
  0x66   : > { %946 = vsyncadd (%p1293_p1), [#allocation3], 4294967168  ;;  %p1294_p3 = pmov %p1293_p1 }
  0x67   : > { %p1295_p6 = pmov %p1293_p1 }
  0x68   : > { %948 = dma.done.wait (%p1294_p3), [#allocation6], 256  }
  0x69   : > { %950 = vsyncadd (%p1295_p6), [#allocation6], 4294967040  ;;  %s281_s12 = sand.u32 1, %s1041_s25   ;;  %s283_s27 = sand.u32 1, %s965_s22  }
  0x6a   : > { %s670_s20 = sshll.u32 %s283_s27, 6  ;;  %s282_s8 = scalar_lea.sflag [#allocation3], %s281_s12 }
  0x6b   : > { %s1187_s10 = scalar_lea.vmem [#allocation7], %s670_s20  ;;  %p1296_p2 = scmp.ne.s32.totalorder %s1284_s7, 0 }
  0x6d   : > { %952 = dma.done.wait (%p1296_p2), %s282_s8, 1024  }
  0x6e   : > { %954 = vsyncadd (%p1296_p2), %s282_s8, 4294966272  ;;  %p318_p4 = scmp.lt.s32.totalorder %s1041_s25, 1  ;;  %p1297_p7 = scmp.ne.s32.totalorder %s1041_s25, 0 }
  0x6f   : > { %v332_v0 = vld [vmem:[#allocation5] sm:$0xff] (!%p1297_p7)  ;;  %v333_v1 = vld [vmem:[#allocation5 + $0x8] sm:$0xff] (!%p1297_p7) }
  0x70   : > { %s1195_s11 = scalar_select %p318_p4, %s1041_s25, 1 }
  0x71   : > { %331 = sbr.rel (%p1297_p7) target bundleno = 120 (0x78), region = 60  ;;  %334 = vst [vmem:[#allocation8] sm:$0xff] (!%p1297_p7), %v332_v0  ;;  %335 = vst [vmem:[#allocation8 + $0x8] sm:$0xff] (!%p1297_p7), %v333_v1 }
  0x72   : > { %s320_s28 = scalar_lea.vmem %s1273_s3, %s1195_s11  ;;  %s323_s14 = scalar_lea.vmem %s1274_s4, %s1195_s11 }
  0x73   : > { %s326_s7 = scalar_lea.vmem %s1275_s5, %s1195_s11 }
  0x78 PF: > { %v802_v2 = vld [vmem:[%s1187_s10] sm:$0xff]   ;;  %v982_v3 = vmov 0.0   ;;  %v803_v4 = vld [vmem:[%s1187_s10 + $0x8] sm:$0xff]   ;;  %vm983_vm0 = vmmov 0   ;;  %v804_v5 = vld [vmem:[%s1187_s10 + $0x10] sm:$0xff]   ;;  %vm459_vm1 = vcmask 130048  }
  0x79   : > { %701 = vmatprep.subr.bf16.mxu0 %v982_v3  ;;  %721 = vmatprep.subr.bf16.mxu1 %v982_v3  ;;  %v805_v6 = vld [vmem:[%s1187_s10 + $0x18] sm:$0xff]   ;;  %v806_v7 = vld [vmem:[%s1187_s10 + $0x20] sm:$0xff]   ;;  %v807_v8 = vld [vmem:[%s1187_s10 + $0x28] sm:$0xff]   ;;  %s984_s20 = smov [#allocation8]   ;;  %p757_p11 = scmp.eq.s32.totalorder %s1041_s25, 1 }
  0x7a   : > { %702 = vmatpush3.bf16.msra.mxu0 %v802_v2  ;;  %717 = vmatprep.mubr.msk.bf16.mxu0 %vm983_vm0, %v982_v3  ;;  %v808_v9 = vld [vmem:[%s1187_s10 + $0x30] sm:$0xff]   ;;  %v809_v10 = vld [vmem:[%s1187_s10 + $0x38] sm:$0xff]   ;;  %v336_v11 = vld [vmem:[#allocation8] sm:$0xff]  ;;  %s560_s8 = sshll.u32 %s984_s20, 4  ;;  %s561_s8 = int_to_ptr.vmem [resolvable:$true] %s560_s8 }
  0x7b   : > { %703 = vmatprep.subr.bf16.mxu0 %v982_v3  ;;  %723 = vmatprep.mubr.msk.bf16.mxu1 %vm983_vm0, %v982_v3  ;;  %v337_v12 = vld [vmem:[#allocation8 + $0x8] sm:$0xff]  ;;  %s901_s10 = scalar_lea.vmem %s561_s8, 256  ;;  %p908_p10 = scmp.lt.s32.totalorder %s561_s8, %s561_s8 }
  0x7c   : > { %v338_v13 = vpack.c.bf16 %v337_v12, %v336_v11  ;;  %v810_v19 = vld [vmem:[#allocation2] sm:$0xff]   ;;  %p902_p13 = scmp.ne.s32.totalorder %s561_s8, %s901_s10  ;;  %p909_p0 = scmp.lt.s32.totalorder %s901_s10, %s901_s10 }
  0x7d   : > { %v680_v20 = vld [vmem:[%s320_s28] ss:$0 sm:$0xff] }
  0x7e   : > { %704 = vmatpush3.bf16.msra.mxu0 %v803_v4  ;;  %v683_v47 = vld [vmem:[%s323_s14] ss:$0 sm:$0xff]  ;;  %p903_p12 = pnand %p902_p13, %p757_p11  ;;  %p910_p5 = por %p909_p0, %p908_p10 }
  0x7f   : > { %705 = vmatprep.subr.bf16.mxu0 %v982_v3  ;;  %v684_v49 = vld [vmem:[%s326_s7] ss:$0 sm:$0xff] }
  0x80   : > { %p904_p8 = pneg %p903_p12 }
  0x82   : > { %706 = vmatpush3.bf16.msra.mxu0 %v804_v5  ;;  %p911_p9 = pnand %p910_p5, %p904_p8 }
  0x83   : > { %707 = vmatprep.subr.bf16.mxu0 %v982_v3 }
  0x86   : > { %708 = vmatpush3.bf16.msra.mxu0 %v805_v6 }
  0x87   : > { %709 = vmatprep.subr.bf16.mxu0 %v982_v3 }
  0x8a   : > { %710 = vmatpush3.bf16.msra.mxu0 %v806_v7 }
  0x8b   : > { %711 = vmatprep.subr.bf16.mxu0 %v982_v3 }
  0x8e   : > { %712 = vmatpush3.bf16.msra.mxu0 %v807_v8 }
  0x8f   : > { %713 = vmatprep.subr.bf16.mxu0 %v982_v3 }
  0x92   : > { %714 = vmatpush3.bf16.msra.mxu0 %v808_v9 }
  0x93   : > { %715 = vmatprep.subr.bf16.mxu0 %v982_v3 }
  0x96   : > { %716 = vmatpush3.bf16.msra.mxu0 %v809_v10 }
  0x99   : > { %718 = vmatmul.mubr.bf16.vlgmr.msra.gmra.mrb[0].mxu0 %v338_v13 }
 0x16c   : > { %v437_v14 = vpop.f32.mrb[0].mxu0 }
 0x16d   : > { %v719_v15 = vpop.f32.mrb[1].mxu0 }
 0x16e   : > { %v440_v16 = vpop.f32.mrb[2].mxu0 }
 0x16f   : > { %v446_v17 = vpack.c.bf16 %v440_v16, %v437_v14  ;;  %v720_v18 = vpop.f32.mrb[3].mxu0 }
 0x171   : > { %722 = vmatpush3.bf16.msra.mxu1 %v446_v17 }
 0x174   : > { %724 = vmatmul.mubr.msk.bf16.vlgmr.msra.gmra.mrb[0].mxu1 %vm459_vm1, %v810_v19 }
 0x247   : > { %v497_v21 = vpop.f32.mrb[0].mxu1 }
 0x248   : > { %v498_v22 = vadd.f32 %v680_v20, %v497_v21  ;;  %v725_v23 = vpop.f32.mrb[1].mxu1 }
 0x249   : > { %v500_v24 = vpop.f32.mrb[2].mxu1 }
 0x24a   : > { %v501_v25 = vadd.f32 %v680_v20, %v500_v24  ;;  %504 = vadd.xlane.f32.xlu0 %v498_v22  ;;  %v726_v26 = vpop.f32.mrb[3].mxu1  ;;  %v508_v27 = vmul.f32 %v498_v22, %v498_v22 }
 0x24c   : > { %510 = vadd.xlane.f32.xlu1 %v508_v27  ;;  %v509_v28 = vmul.f32 %v501_v25, %v501_v25 }
 0x24e   : > { %506 = vadd.xlane.f32.xlu0 %v501_v25 }
 0x250   : > { %512 = vadd.xlane.f32.xlu1 %v509_v28 }
 0x2d7   : > { %v505_v29 = vpop.xlane.xlu0 %504 }
 0x2d8   : > { %v514_v30 = vmul.f32 0.03125, %v505_v29 }
 0x2d9   : > { %v511_v31 = vpop.xlane.xlu1 %510 }
 0x2da   : > { %v518_v32 = vmul.f32 %v514_v30, %v514_v30  ;;  %v516_v33 = vmul.f32 0.03125, %v511_v31  ;;  %v524_v45 = vsub.f32 %v498_v22, %v514_v30 }
 0x2db   : > { %v507_v34 = vpop.xlane.xlu0 %506 }
 0x2dc   : > { %v520_v35 = vsub.f32 %v516_v33, %v518_v32  ;;  %v515_v36 = vmul.f32 0.03125, %v507_v34 }
 0x2dd   : > { %v513_v37 = vpop.xlane.xlu1 %512 }
 0x2de   : > { %v522_v38 = vmax.f32 %v520_v35, 0.0  ;;  %v519_v39 = vmul.f32 %v515_v36, %v515_v36  ;;  %v517_v40 = vmul.f32 0.03125, %v513_v37  ;;  %v525_v50 = vsub.f32 %v501_v25, %v515_v36 }
 0x2e0   : > { %v526_v41 = vadd.f32 1e-05, %v522_v38  ;;  %v521_v42 = vsub.f32 %v517_v40, %v519_v39 }
 0x2e2   : > { %811 = vrsqrt.f32 %v526_v41  ;;  %v523_v43 = vmax.f32 %v521_v42, 0.0 }
 0x2e4   : > { %v527_v44 = vadd.f32 1e-05, %v523_v43 }
 0x2e6   : > { %813 = vrsqrt.f32 %v527_v44 }
 0x2ec   : > { %v812_v46 = vpop.eup %811 }
 0x2ed   : > { %v530_v48 = vmul.f32 %v812_v46, %v524_v45 }
 0x2ef   : > { %v539_v51 = vmul.f32 %v683_v47, %v530_v48 }
 0x2f0   : > { %v814_v52 = vpop.eup %813 }
 0x2f1   : > { %v531_v53 = vmul.f32 %v814_v52, %v525_v50  ;;  %v548_v54 = vadd.f32 %v684_v49, %v539_v51 }
 0x2f3   : > { %v540_v55 = vmul.f32 %v683_v47, %v531_v53  ;;  %v550_v56 = vmax.f32 %v548_v54, 0.0 }
 0x2f5   : > { %v549_v57 = vadd.f32 %v684_v49, %v540_v55  ;;  %552 = vst [vmem:[#allocation8] sm:$0xff] %v550_v56 }
 0x2f7   : > { %v551_v58 = vmax.f32 %v549_v57, 0.0 }
 0x2f9   : > { %553 = vst [vmem:[#allocation8 + $0x8] sm:$0xff] %v551_v58 }
 0x2fa   : > { %914 = shalt.err (!%p911_p9)
}
 0x2fb   : > { %s915_s24 = scalar_lea.hbm %s1276_s6, 256 }
 0x2fc   : > { %p916_p1 = scmp.ne.s32.totalorder %s1276_s6, %s915_s24  ;;  %p921_p2 = scmp.lt.u32.totalorder %s915_s24, %s1276_s6 }
 0x2fe   : > { %p917_p3 = pnand %p916_p1, %p757_p11 }
 0x300   : > { %p918_p6 = pneg %p917_p3 }
 0x302   : > { %p923_p4 = pnand %p921_p2, %p918_p6 }
 0x304   : > { %926 = shalt.err (!%p923_p4)
}
 0x305   : > { %s985_s21 = smov 128   ;;  %s986_s15 = smov 8  }
 0x306   : > { %738 = dma.vmem_to_hbm [thread:$0]  (%p757_p11), %s561_s8, 256, %s1276_s6, [#allocation4], %s985_s21, %s985_s21, %s986_s15  }
 0x307   : > { %956 = dma.done.wait (%p757_p11), [#allocation4], 256  }
 0x308   : > { %958 = vsyncadd (%p757_p11), [#allocation4], 4294967040 }
 0x309 PF: > { %p16_p7 = scmp.ge.s32.totalorder %s1044_s26, 4   ;;  %s1298_s21 = smov %s965_s22 }
 0x30a   : > { %s1299_s22 = smov %s969_s23  ;;  %s1300_s23 = smov %s1054_s29 }
 0x30b   : > { %s1301_s24 = smov %s1044_s26  ;;  %18 = sbr.rel (!%p16_p7) target bundleno = 4 (0x4), region = 101 }
 0x312   :  { %576 = vsyncpa [#allocation3], 1 }
 0x313   :  { %578 = vsyncpa [#allocation3 + $0x1], 1 }
 0x314   :  { %579 = vsyncpa [#allocation6], 1 }
 0x315   :  { %580 = vsyncpa [#allocation4], 1 }
 0x316   :  { %582 = vsyncpa [#allocation4 + $0x1], 1 }

</bundles_post_ra>
